<compile_context>
chip_gen: v6e
topology: v6e:2x2x1
jax: 0.10.0
libtpu: 0.0.40
codegen_flags: <defaults>
</compile_context>

<pallas_src>
import functools

import jax
import jax.numpy as jnp
from jax.experimental import pallas as pl
from jax.experimental.pallas import tpu as pltpu


def _round_up(x, m):
    return ((x + m - 1) // m) * m


def _pick_tile(np128):
    """Largest of (512, 256, 128) that still yields >= 2 row tiles (megacore)."""
    for t in (512, 256, 128):
        if np128 >= 2 * t:
            return t
    return np128  # tiny graph: single tile


def _vmem_limit(budget_bytes):
    # Raise above v5e's 16 MiB scoped default; cap below v7x's 64 MiB physical.
    return int(min(48 * 1024 * 1024, max(32 * 1024 * 1024, budget_bytes + (4 << 20))))


_T_RESIDENT_BYTES = 8 * 1024 * 1024  # keep T fully VMEM-resident below this size


# --------------------------------------------------------------------- feature transform
def _transform_kernel(f_ref, w_ref, o_ref):
    """T[i] = F[i] @ W  (bf16 in, f32 MXU accumulate, bf16 out)."""
    o_ref[...] = jnp.dot(f_ref[...], w_ref[...],
                         preferred_element_type=jnp.float32).astype(o_ref.dtype)


def feature_transform(feat, w, *, tm):
    """feat: [NP, FP] bf16, w: [FP, HP] bf16  ->  [NP, HP] bf16."""
    np_, fp = feat.shape
    hp = w.shape[1]
    budget = 2 * tm * fp * 2 + 2 * fp * hp * 2 + 2 * tm * hp * 2
    return pl.pallas_call(
        _transform_kernel,
        out_shape=jax.ShapeDtypeStruct((np_, hp), jnp.bfloat16),
        grid=(np_ // tm,),
        in_specs=[
            pl.BlockSpec((tm, fp), lambda i: (i, 0)),   # feature row tile
            pl.BlockSpec((fp, hp), lambda i: (0, 0)),   # weight (constant index)
        ],
        out_specs=pl.BlockSpec((tm, hp), lambda i: (i, 0)),
        compiler_params=pltpu.CompilerParams(
            dimension_semantics=("parallel",),
            vmem_limit_bytes=_vmem_limit(budget),
        ),
    )(feat, w)


# ------------------------------------------------------------------------- aggregation
def _agg_prelu_kernel(kidx_ref, kcnt_ref, a_ref, t_ref, b_ref, alpha_ref, o_ref,
                      acc_ref, *, t_resident, tk):
    """acc[i] += A[i, kidx[i,k]] @ T[kidx[i,k]]; epilogue: bias + PReLU -> bf16."""
    i = pl.program_id(0)
    k = pl.program_id(1)

    @pl.when(k == 0)
    def _():
        acc_ref[...] = jnp.zeros_like(acc_ref)

    @pl.when(k < kcnt_ref[i])                      # skip all-zero A column blocks
    def _():
        if t_resident:
            off = pl.multiple_of(kidx_ref[i, k] * tk, tk)
            t = t_ref[pl.ds(off, tk), :]
        else:
            t = t_ref[...]
        acc_ref[...] += jnp.dot(a_ref[...], t, preferred_element_type=jnp.float32)

    @pl.when(k == pl.num_programs(1) - 1)
    def _():
        h = acc_ref[...] + b_ref[...]
        h = jnp.maximum(h, 0.0) + alpha_ref[...] * jnp.minimum(h, 0.0)   # PReLU
        o_ref[...] = h.astype(o_ref.dtype)


def _agg_linear_kernel(kidx_ref, kcnt_ref, a_ref, t_ref, b_ref, o_ref,
                       *, t_resident, tk):
    """f32 output block is resident across k: init with bias, accumulate in place."""
    i = pl.program_id(0)
    k = pl.program_id(1)

    @pl.when(k == 0)
    def _():
        o_ref[...] = jnp.zeros(o_ref.shape, o_ref.dtype) + b_ref[...]

    @pl.when(k < kcnt_ref[i])                      # skip all-zero A column blocks
    def _():
        if t_resident:
            off = pl.multiple_of(kidx_ref[i, k] * tk, tk)
            t = t_ref[pl.ds(off, tk), :]
        else:
            t = t_ref[...]
        o_ref[...] += jnp.dot(a_ref[...], t, preferred_element_type=jnp.float32)


def gcn_aggregate(a, t, b, kidx, kcnt, *, alpha, apply_prelu, out_dtype,
                  tm, tk, t_resident):
    """A: [NP,NP] bf16, T: [NP,HP] bf16, b/alpha: [1,HP] f32 -> [NP,HP] out_dtype."""
    np_ = a.shape[0]
    hp = t.shape[1]
    nrt, nkt = np_ // tm, np_ // tk

    a_spec = pl.BlockSpec((tm, tk), lambda i, k, ki, kc: (i, ki[i, k]))
    if t_resident:
        t_spec = pl.BlockSpec((np_, hp), lambda i, k, ki, kc: (0, 0))
        t_bytes = 2 * np_ * hp * 2
    else:
        t_spec = pl.BlockSpec((tk, hp), lambda i, k, ki, kc: (ki[i, k], 0))
        t_bytes = 2 * tk * hp * 2
    vec_spec = pl.BlockSpec((1, hp), lambda i, k, ki, kc: (0, 0))
    out_spec = pl.BlockSpec((tm, hp), lambda i, k, ki, kc: (i, 0))

    out_item = jnp.dtype(out_dtype).itemsize
    budget = 2 * tm * tk * 2 + t_bytes + 2 * tm * hp * out_item + 4 * hp * 4

    if apply_prelu:
        kernel = functools.partial(_agg_prelu_kernel, t_resident=t_resident, tk=tk)
        in_specs = [a_spec, t_spec, vec_spec, vec_spec]
        scratch = [pltpu.VMEM((tm, hp), jnp.float32)]
        operands = (kidx, kcnt, a, t, b, alpha)
        budget += tm * hp * 4
    else:
        # f32 output doubles as the accumulator; alpha operand dropped entirely.
        kernel = functools.partial(_agg_linear_kernel, t_resident=t_resident, tk=tk)
        in_specs = [a_spec, t_spec, vec_spec]
        scratch = []
        operands = (kidx, kcnt, a, t, b)

    return pl.pallas_call(
        kernel,
        out_shape=jax.ShapeDtypeStruct((np_, hp), out_dtype),
        grid_spec=pltpu.PrefetchScalarGridSpec(
            num_scalar_prefetch=2,
            grid=(nrt, nkt),
            in_specs=in_specs,
            out_specs=out_spec,
            scratch_shapes=scratch,
        ),
        compiler_params=pltpu.CompilerParams(
            dimension_semantics=("parallel", "arbitrary"),
            vmem_limit_bytes=_vmem_limit(budget),
        ),
    )(*operands)


# -------------------------------------------------------------------------- adjacency
def build_normalized_adjacency(edge_index, num_nodes, *, padded_to=None,
                               out_dtype=jnp.float32):
    """Dense D^{-1/2}(A+I)D^{-1/2} matching PyG gcn_norm(add_self_loops=True).

    Built directly at the padded size and cast in one pass (no second padded copy).
    Duplicate (non-self-loop) edges scatter-add; self-loop weight is exactly 1.0.
    Padded rows/cols stay zero (deg 0 -> d_inv_sqrt 0).
    """
    np_ = num_nodes if padded_to is None else padded_to
    src, dst = edge_index[0], edge_index[1]
    not_loop = (src != dst).astype(jnp.float32)
    a = jnp.zeros((np_, np_), jnp.float32).at[dst, src].add(not_loop)
    idx = jnp.arange(num_nodes)
    a = a.at[idx, idx].add(1.0)                          # self-loop weight 1.0
    deg = a.sum(axis=1)
    d = jnp.where(deg > 0, jax.lax.rsqrt(deg), 0.0)
    return (d[:, None] * a * d[None, :]).astype(out_dtype)


def build_tile_schedule(edge_index, num_nodes, np_, tm, tk):
    """Per-row-tile compacted list of non-empty A column blocks (O(E), from edges).

    Returns kidx [nrt, nkt] int32 (non-empty block indices first, then the last
    valid index repeated so skipped steps re-use the same block -> no extra DMA)
    and kcnt [nrt] int32 (number of non-empty blocks per row tile).
    """
    nrt, nkt = np_ // tm, np_ // tk
    src, dst = edge_index[0], edge_index[1]
    occ = jnp.zeros((nrt, nkt), jnp.int32)
    occ = occ.at[dst // tm, src // tk].add(1)            # edges (superset incl. loops)
    v = jnp.arange(num_nodes)
    occ = occ.at[v // tm, v // tk].add(1)                # self-loops (diagonal blocks)
    nonempty = occ > 0
    kcnt = nonempty.sum(axis=1).astype(jnp.int32)
    order = jnp.argsort(jnp.logical_not(nonempty).astype(jnp.int32), axis=1)
    last = jnp.take_along_axis(order, jnp.maximum(kcnt - 1, 0)[:, None], axis=1)
    ks = jnp.arange(nkt)[None, :]
    kidx = jnp.where(ks < kcnt[:, None], order, last).astype(jnp.int32)
    return kidx, kcnt


# ---------------------------------------------------------------------------- forward
def gnn_encoder_forward(x, edge_index, w1, b1, alpha, w2, b2):
    """x: [N,Fin] f32, edge_index: [2,E] int, w1:[Fin,H], b1/alpha:[1,H], w2:[H,H], b2:[1,H]."""
    n, fin = x.shape
    hid = w1.shape[1]

    # Tile / padding geometry: lane dims padded to 128, node dim padded to tile size.
    np128 = _round_up(n, 128)
    tm = tk = _pick_tile(np128)
    np_ = _round_up(np128, tm)
    fp = _round_up(fin, 128)
    hp = _round_up(hid, 128)

    a_p = build_normalized_adjacency(edge_index, n, padded_to=np_,
                                     out_dtype=jnp.bfloat16)
    kidx, kcnt = build_tile_schedule(edge_index, n, np_, tm, tk)

    x_p = jnp.zeros((np_, fp), jnp.bfloat16).at[:n, :fin].set(x.astype(jnp.bfloat16))
    w1_p = jnp.zeros((fp, hp), jnp.bfloat16).at[:fin, :hid].set(w1.astype(jnp.bfloat16))
    w2_p = jnp.zeros((hp, hp), jnp.bfloat16).at[:hid, :hid].set(w2.astype(jnp.bfloat16))
    b1_p = jnp.zeros((1, hp), jnp.float32).at[:, :hid].set(b1.reshape(1, -1))
    b2_p = jnp.zeros((1, hp), jnp.float32).at[:, :hid].set(b2.reshape(1, -1))
    alpha_p = jnp.zeros((1, hp), jnp.float32).at[:, :hid].set(alpha.reshape(1, -1))

    t_resident = (np_ * hp * 2) <= _T_RESIDENT_BYTES

    # Layer 1: T1 = X W1 (once), H1 = PReLU(A_hat @ T1 + b1)  (bf16 intermediate).
    t1 = feature_transform(x_p, w1_p, tm=tm)
    h1 = gcn_aggregate(a_p, t1, b1_p, kidx, kcnt, alpha=alpha_p,
                       apply_prelu=True, out_dtype=jnp.bfloat16,
                       tm=tm, tk=tk, t_resident=t_resident)
    # TODO(synk): Dropout(p=0.1) implemented as eval-mode identity; the training-mode
    # stochastic mask (scaled by 1/0.9) is not reproduced here.

    # Layer 2: T2 = H1 W2 (once), H2 = A_hat @ T2 + b2  (f32, accumulate into output).
    t2 = feature_transform(h1, w2_p, tm=tm)
    h2 = gcn_aggregate(a_p, t2, b2_p, kidx, kcnt, alpha=None,
                       apply_prelu=False, out_dtype=jnp.float32,
                       tm=tm, tk=tk, t_resident=t_resident)

    return h2[:n, :hid]


# ------------------------------------------------------------------------------- main
if __name__ == "__main__":
    # Small synthetic graph consistent with GNNEncoder(in_channels, hidden_channels)
    N = 16            # nodes
    IN_CH = 8         # in_channels
    HID = 32          # hidden_channels
    E = 40            # directed edges

    key = jax.random.PRNGKey(0)
    k_x, k_e1, k_e2, k_w1, k_w2 = jax.random.split(key, 5)

    x = jax.random.normal(k_x, (N, IN_CH), dtype=jnp.float32)
    src = jax.random.randint(k_e1, (E,), 0, N)
    dst = jax.random.randint(k_e2, (E,), 0, N)
    edge_index = jnp.stack([src, dst], axis=0)

    # Glorot-like GCN weights, zero bias, PReLU alpha = 0.25 (nn.PReLU default).
    w1 = jax.random.normal(k_w1, (IN_CH, HID), jnp.float32) * (1.0 / jnp.sqrt(IN_CH))
    b1 = jnp.zeros((1, HID), jnp.float32)
    w2 = jax.random.normal(k_w2, (HID, HID), jnp.float32) * (1.0 / jnp.sqrt(HID))
    b2 = jnp.zeros((1, HID), jnp.float32)
    alpha = jnp.full((1, HID), 0.25, jnp.float32)

    out = gnn_encoder_forward(x, edge_index, w1, b1, alpha, w2, b2)
    out = jax.block_until_ready(out)

    # Pure-JAX f32 reference (same math, no padding / bf16).
    a_ref = build_normalized_adjacency(edge_index, N)
    h1_ref = a_ref @ (x @ w1) + b1
    h1_ref = jnp.where(h1_ref > 0.0, h1_ref, alpha * h1_ref)
    ref = a_ref @ (h1_ref @ w2) + b2

    assert out.shape == (N, HID) and out.dtype == jnp.float32
    max_err = float(jnp.max(jnp.abs(out - ref)))
    assert max_err < 1e-1, f"max abs err {max_err}"
    print("KERNEL_OK")
</pallas_src>

<mosaic_0001>
module attributes {stable_mosaic.version = 11 : i64} {
  func.func @_transform_kernel(%arg0: i32, %arg1: memref<128x128xbf16, #tpu.memory_space<vmem>>, %arg2: memref<128x128xbf16, #tpu.memory_space<vmem>>, %arg3: memref<128x128xbf16, #tpu.memory_space<vmem>>) attributes {dimension_semantics = [#tpu.dimension_semantics<parallel>], iteration_bounds = array<i64: 1>, scalar_prefetch = 0 : i64, scratch_operands = 0 : i64, tpu.core_type = #tpu.core_type<tc>, window_params = [{transform_indices = @transform_0, window_bounds = array<i64: 128, 128>}, {pipeline_mode = #tpu.pipeline_mode<synchronous>, transform_indices = @transform_1, window_bounds = array<i64: 128, 128>}, {transform_indices = @transform_2, window_bounds = array<i64: 128, 128>}]} {
    %c0 = arith.constant 0 : index
    %c0_0 = arith.constant 0 : index
    %0 = vector.load %arg1[%c0, %c0_0] : memref<128x128xbf16, #tpu.memory_space<vmem>>, vector<128x128xbf16>
    %c0_1 = arith.constant 0 : index
    %c0_2 = arith.constant 0 : index
    %1 = vector.load %arg2[%c0_1, %c0_2] : memref<128x128xbf16, #tpu.memory_space<vmem>>, vector<128x128xbf16>
    %cst = arith.constant dense<0.000000e+00> : vector<128x128xf32>
    %2 = tpu.matmul %0, %1, %cst {dimension_numbers = #tpu.dot_dimension_numbers<[1], [0], [0], [1], [0, 0, 1, 1], [], []>} : vector<128x128xbf16>, vector<128x128xbf16>, vector<128x128xf32> -> vector<128x128xf32>
    %3 = arith.truncf %2 : vector<128x128xf32> to vector<128x128xbf16>
    %c0_3 = arith.constant 0 : index
    %c0_4 = arith.constant 0 : index
    %4 = vector.load %arg3[%c0_3, %c0_4] : memref<128x128xbf16, #tpu.memory_space<vmem>>, vector<128x128xbf16>
    tpu.vector_store %arg3[%c0_3, %c0_4], %3 {strides = array<i32>} : memref<128x128xbf16, #tpu.memory_space<vmem>>, vector<128x128xbf16>,
    return
  }
  func.func @transform_0(%arg0: i32) -> (i32, i32) {
    %c0_i32 = arith.constant 0 : i32
    %c0_i32_0 = arith.constant 0 : i32
    return %arg0, %c0_i32 : i32, i32
  }
  func.func @transform_1(%arg0: i32) -> (i32, i32) {
    %c0_i32 = arith.constant 0 : i32
    %c0_i32_0 = arith.constant 0 : i32
    %c0_i32_1 = arith.constant 0 : i32
    return %c0_i32, %c0_i32_0 : i32, i32
  }
  func.func @transform_2(%arg0: i32) -> (i32, i32) {
    %c0_i32 = arith.constant 0 : i32
    %c0_i32_0 = arith.constant 0 : i32
    return %arg0, %c0_i32 : i32, i32
  }
}

</mosaic_0001>

<bundles_post_ra>
// kernel: tpu_custom_call.1
= control target key start
LH: loop header
LB: loop body
LE: loop exit
PB: predicated region body
PF: predicated region fallthrough
CT: control target
= control target key end

     0   :  { %7 = vsyncpa [#allocation3], 0  ;;  %s648_s0 = inlined_call_operand.hbm [shape: bf16[128,128], index: 0, kind: input, shape index: {}]   ;;  %s649_s1 = inlined_call_operand.hbm [shape: bf16[128,128], index: 1, kind: input, shape index: {}]   ;;  %s650_s2 = inlined_call_operand.hbm [shape: bf16[128,128], index: 2, kind: output, shape index: {}]  }
   0x1   :  { %8 = vsyncpa [#allocation6], 0 }
   0x2   :  { %9 = vsyncpa [#allocation4], 0  ;;  %s610_s9 = smov [#allocation2]  }
   0x3   :  { %s15_s10 = sshll.u32 %s610_s9, 4  ;;  %s16_s10 = int_to_ptr.vmem [resolvable:$true] %s15_s10 }
   0x4   :  { %s552_s11 = scalar_lea.vmem %s16_s10, 1024  ;;  %p557_p1 = scmp.lt.s32.totalorder %s16_s10, %s16_s10 }
   0x5   :  { %p553_p0 = scmp.ne.s32.totalorder %s16_s10, %s552_s11  ;;  %p558_p2 = scmp.lt.s32.totalorder %s552_s11, %s552_s11 }
   0x7   :  { %p559_p3 = por %p558_p2, %p557_p1 }
   0x9   :  { %p560_p4 = pnand %p559_p3, %p553_p0 }
   0xb   :  { %563 = shalt.err (!%p560_p4)
}
   0xc   :  { %s611_s12 = smov 64   ;;  %s612_s13 = smov 4  }
   0xd   :  { %21 = dma.hbm_to_vmem [thread:$0]  %s648_s0, 1024, %s16_s10, [#allocation3], %s611_s12, %s611_s12, %s612_s13  }
   0xe   :  { %s613_s16 = smov [#allocation5]  }
   0xf   :  { %s27_s17 = sshll.u32 %s613_s16, 4  ;;  %s28_s17 = int_to_ptr.vmem [resolvable:$true] %s27_s17 }
  0x10   :  { %s572_s18 = scalar_lea.vmem %s28_s17, 1024  ;;  %p577_p6 = scmp.lt.s32.totalorder %s28_s17, %s28_s17 }
  0x11   :  { %p573_p5 = scmp.ne.s32.totalorder %s28_s17, %s572_s18  ;;  %p578_p7 = scmp.lt.s32.totalorder %s572_s18, %s572_s18 }
  0x13   :  { %p579_p8 = por %p578_p7, %p577_p6 }
  0x15   :  { %p580_p9 = pnand %p579_p8, %p573_p5 }
  0x17   :  { %583 = shalt.err (!%p580_p9)
}
  0x18   :  { %33 = dma.hbm_to_vmem [thread:$0]  %s649_s1, 1024, %s28_s17, [#allocation6], %s611_s12, %s611_s12, %s612_s13  }
  0x19   :  { %604 = dma.done.wait [#allocation3], 1024  }
  0x1a   :  { %605 = vsyncadd [#allocation3], 4294966272 }
  0x1b   :  { %606 = dma.done.wait [#allocation6], 1024  }
  0x1c   :  { %607 = vsyncadd [#allocation6], 4294966272  ;;  %v528_v0 = vld [vmem:[#allocation5 + $0x38] sm:$0xff]   ;;  %v529_v1 = vld [vmem:[#allocation5 + $0x30] sm:$0xff]   ;;  %s614_s0 = smov [#allocation7]  }
  0x1d   :  { %475 = vmatprep.subr.bf16.mxu0 %v528_v0  ;;  %507 = vmatprep.subr.bf16.mxu1 %v528_v0  ;;  %v530_v2 = vld [vmem:[#allocation5 + $0x28] sm:$0xff]   ;;  %v531_v3 = vld [vmem:[#allocation5 + $0x20] sm:$0xff]   ;;  %v532_v6 = vld [vmem:[#allocation5 + $0x18] sm:$0xff]   ;;  %s351_s1 = sshll.u32 %s614_s0, 4  ;;  %s352_s1 = int_to_ptr.vmem [resolvable:$true] %s351_s1 }
  0x1e   :  { %476 = vmatpush3.bf16.msra.mxu0 %v528_v0  ;;  %515 = vmatpush3.bf16.msra.mxu1 %v528_v0  ;;  %v536_v4 = vld [vmem:[#allocation2] sm:$0xff]   ;;  %v533_v7 = vld [vmem:[#allocation5 + $0x10] sm:$0xff]   ;;  %v534_v8 = vld [vmem:[#allocation5 + $0x8] sm:$0xff]   ;;  %s584_s21 = scalar_lea.vmem %s352_s1, 1024  ;;  %p589_p11 = scmp.lt.s32.totalorder %s352_s1, %s352_s1 }
  0x1f   :  { %477 = vmatprep.subr.bf16.mxu0 %v529_v1  ;;  %508 = vmatprep.subr.bf16.mxu1 %v529_v1  ;;  %v537_v5 = vld [vmem:[#allocation2 + $0x20] sm:$0xff]   ;;  %v538_v10 = vld [vmem:[#allocation2 + $0x8] sm:$0xff]   ;;  %v540_v12 = vld [vmem:[#allocation2 + $0x10] sm:$0xff]   ;;  %p585_p10 = scmp.ne.s32.totalorder %s352_s1, %s584_s21  ;;  %p590_p12 = scmp.lt.s32.totalorder %s584_s21, %s584_s21 }
  0x20   :  { %491 = vmatprep.mubr.bf16.mxu0 %v536_v4  ;;  %499 = vmatprep.mubr.bf16.mxu1 %v537_v5  ;;  %v535_v9 = vld [vmem:[#allocation5] sm:$0xff]   ;;  %v539_v11 = vld [vmem:[#allocation2 + $0x28] sm:$0xff]   ;;  %v541_v13 = vld [vmem:[#allocation2 + $0x30] sm:$0xff]  }
  0x21   :  { %v542_v14 = vld [vmem:[#allocation2 + $0x18] sm:$0xff]   ;;  %p591_p13 = por %p590_p12, %p589_p11 }
  0x22   :  { %478 = vmatpush3.bf16.msra.mxu0 %v529_v1  ;;  %516 = vmatpush3.bf16.msra.mxu1 %v529_v1  ;;  %v543_v15 = vld [vmem:[#allocation2 + $0x38] sm:$0xff]  }
  0x23   :  { %479 = vmatprep.subr.bf16.mxu0 %v530_v2  ;;  %509 = vmatprep.subr.bf16.mxu1 %v530_v2  ;;  %p592_p0 = pnand %p591_p13, %p585_p10 }
  0x26   :  { %480 = vmatpush3.bf16.msra.mxu0 %v530_v2  ;;  %517 = vmatpush3.bf16.msra.mxu1 %v530_v2 }
  0x27   :  { %481 = vmatprep.subr.bf16.mxu0 %v531_v3  ;;  %510 = vmatprep.subr.bf16.mxu1 %v531_v3 }
  0x2a   :  { %482 = vmatpush3.bf16.msra.mxu0 %v531_v3  ;;  %518 = vmatpush3.bf16.msra.mxu1 %v531_v3 }
  0x2b   :  { %483 = vmatprep.subr.bf16.mxu0 %v532_v6  ;;  %511 = vmatprep.subr.bf16.mxu1 %v532_v6 }
  0x2e   :  { %484 = vmatpush3.bf16.msra.mxu0 %v532_v6  ;;  %519 = vmatpush3.bf16.msra.mxu1 %v532_v6 }
  0x2f   :  { %485 = vmatprep.subr.bf16.mxu0 %v533_v7  ;;  %512 = vmatprep.subr.bf16.mxu1 %v533_v7 }
  0x32   :  { %486 = vmatpush3.bf16.msra.mxu0 %v533_v7  ;;  %520 = vmatpush3.bf16.msra.mxu1 %v533_v7 }
  0x33   :  { %487 = vmatprep.subr.bf16.mxu0 %v534_v8  ;;  %513 = vmatprep.subr.bf16.mxu1 %v534_v8 }
  0x36   :  { %488 = vmatpush3.bf16.msra.mxu0 %v534_v8  ;;  %521 = vmatpush3.bf16.msra.mxu1 %v534_v8 }
  0x37   :  { %489 = vmatprep.subr.bf16.mxu0 %v535_v9  ;;  %514 = vmatprep.subr.bf16.mxu1 %v535_v9 }
  0x3a   :  { %490 = vmatpush3.bf16.msra.mxu0 %v535_v9  ;;  %522 = vmatpush3.bf16.msra.mxu1 %v535_v9 }
  0x3d   :  { %492 = vmatmul.mubr.bf16.vlgmr.msra.gmra.mxu0 %v538_v10  ;;  %500 = vmatmul.mubr.bf16.vlgmr.msra.gmra.mxu1 %v539_v11 }
  0x3e   :  { %495 = vmatprep.mubr.bf16.mxu0 %v540_v12  ;;  %503 = vmatprep.mubr.bf16.mxu1 %v541_v13 }
  0x45   :  { %496 = vmatmul.mubr.bf16.gmra.mxu0 %v542_v14  ;;  %504 = vmatmul.mubr.bf16.gmra.mxu1 %v543_v15 }
  0xfd   :  { %v493_v16 = vpop.f32.mrf.mxu0  ;;  %v501_v17 = vpop.f32.mrf.mxu1 }
  0xff   :  { %v203_v18 = vpop.f32.mrf.mxu0  ;;  %v235_v19 = vpop.f32.mrf.mxu1 }
 0x101   :  { %v494_v20 = vpop.f32.mrf.mxu0  ;;  %v502_v21 = vpop.f32.mrf.mxu1 }
 0x102   :  { %v420_v22 = vpack.c.bf16 %v494_v20, %v493_v16  ;;  %v440_v23 = vpack.c.bf16 %v502_v21, %v501_v17 }
 0x103   :  { %v206_v24 = vpop.f32.mrf.mxu0  ;;  %v238_v25 = vpop.f32.mrf.mxu1 }
 0x104   :  { %452 = vst [vmem:[#allocation7 + $0x8] sm:$0xff] %v420_v22   ;;  %456 = vst [vmem:[#allocation7 + $0x28] sm:$0xff] %v440_v23   ;;  %v415_v26 = vpack.c.bf16 %v206_v24, %v203_v18  ;;  %v435_v27 = vpack.c.bf16 %v238_v25, %v235_v19 }
 0x105   :  { %v497_v28 = vpop.f32.mrf.mxu0  ;;  %v505_v29 = vpop.f32.mrf.mxu1 }
 0x106   :  { %416 = vst [vmem:[#allocation7] sm:$0xff] %v415_v26   ;;  %455 = vst [vmem:[#allocation7 + $0x20] sm:$0xff] %v435_v27  }
 0x107   :  { %v219_v30 = vpop.f32.mrf.mxu0  ;;  %v251_v31 = vpop.f32.mrf.mxu1 }
 0x109   :  { %v498_v32 = vpop.f32.mrf.mxu0  ;;  %v506_v33 = vpop.f32.mrf.mxu1 }
 0x10a   :  { %v430_v34 = vpack.c.bf16 %v498_v32, %v497_v28  ;;  %v450_v35 = vpack.c.bf16 %v506_v33, %v505_v29 }
 0x10b   :  { %v222_v36 = vpop.f32.mrf.mxu0  ;;  %v254_v37 = vpop.f32.mrf.mxu1 }
 0x10c   :  { %454 = vst [vmem:[#allocation7 + $0x18] sm:$0xff] %v430_v34   ;;  %458 = vst [vmem:[#allocation7 + $0x38] sm:$0xff] %v450_v35   ;;  %v425_v38 = vpack.c.bf16 %v222_v36, %v219_v30  ;;  %v445_v39 = vpack.c.bf16 %v254_v37, %v251_v31 }
 0x10e   :  { %453 = vst [vmem:[#allocation7 + $0x10] sm:$0xff] %v425_v38   ;;  %457 = vst [vmem:[#allocation7 + $0x30] sm:$0xff] %v445_v39  }
 0x10f   :  { %595 = shalt.err (!%p592_p0)
}
 0x110   :  { %357 = dma.vmem_to_hbm [thread:$0]  %s352_s1, 1024, %s650_s2, [#allocation4], %s611_s12, %s611_s12, %s612_s13  }
 0x111   :  { %608 = dma.done.wait [#allocation4], 1024  }
 0x112   :  { %609 = vsyncadd [#allocation4], 4294966272 }
 0x113   :  { %361 = vsyncpa [#allocation3], 1 }
 0x114   :  { %362 = vsyncpa [#allocation6], 1 }
 0x115   :  { %363 = vsyncpa [#allocation4], 1 }

</bundles_post_ra>
